<compile_context>
chip_gen: v7x
topology: tpu7x:2x2x1
jax: 0.10.0
libtpu: 0.0.40
codegen_flags: <defaults>
</compile_context>

<pallas_src>
import math
import functools

import jax
import jax.numpy as jnp
from jax import lax
from jax.experimental import pallas as pl
from jax.experimental.pallas import tpu as pltpu


def _ghost_kernel(x_ref, p_ref, out_ref, *, cin, cinit, oup, H, t1):
    """One (R, L) row-chunk; R is a multiple of H so blocks hold whole images.

    x_ref : (R, L)     input slab; channel c of pixel (h, w) at lane w*oup + c,
                       lanes c >= cin are zero padding.
    p_ref : (t1+13, L) packed per-lane params:
              rows [0, t1)       1x1-conv weights at OUTPUT lane positions
                                 (row r <-> lane shift t = r - (cin-1))
              rows [t1, t1+9)    depthwise 3x3 weights at SOURCE (x1-slot) lane
                                 positions, row (dy+1)*3+(dx+1); W-border and
                                 slot masks folded in
              rows [t1+9,t1+13)  folded BN [scale_x1, shift_x1, scale_x2,
                                 shift_x2]; zero outside the owning slots
    out_ref: (R, L)    x1 in channel slots [0, cinit), x2 in [cinit, oup).
    """
    x = x_ref[...]                      # (R, L) f32
    R, L = x.shape

    def lane_roll(v, s):                # static shift, lane axis
        s = s % L
        return v if s == 0 else pltpu.roll(v, shift=s, axis=1)

    def row_roll(v, s):                 # static shift, sublane axis
        s = s % R
        return v if s == 0 else pltpu.roll(v, shift=s, axis=0)

    # ---- primary 1x1 conv: rolled VPU FMA chain (XLU rolls, MXU idle) ------
    # TODO(synk): for real GhostNet widths (cinit >= 16) switch this to an MXU
    # matmul; the O(cin+cinit) roll chain only wins at tiny channel counts.
    acc1 = x * p_ref[cin - 1:cin, :]                      # t = 0 term
    for r in range(t1):
        t = r - (cin - 1)
        if t == 0:
            continue
        acc1 = acc1 + lane_roll(x, t) * p_ref[r:r + 1, :]
    # folded BatchNorm + ReLU; x2 slots have scale=shift=0 -> stay exactly 0.
    x1 = jnp.maximum(acc1 * p_ref[t1 + 9:t1 + 10, :] + p_ref[t1 + 10:t1 + 11, :],
                     0.0)

    # ---- cheap op: depthwise 3x3 (pad=1) ------------------------------------
    # Per-image row masks (blocks hold whole images, so local_row % H is the
    # image-relative row; wraparound rows from row_roll are always masked).
    row_in_img = lax.broadcasted_iota(jnp.int32, (R, L), 0) % H
    xs_m1 = jnp.where(row_in_img >= 1, row_roll(x1, 1), 0.0)       # x1[h-1]
    xs_p1 = jnp.where(row_in_img <= H - 2, row_roll(x1, -1), 0.0)  # x1[h+1]
    xs = (xs_m1, x1, xs_p1)                                         # index dy+1

    # Accumulate each dx-group at the x1-slot lane positions (weights laid out
    # at source positions), then one lane roll per dx moves the group onto the
    # x2 slots: 2 row rolls + 3 lane rolls total (was 11).
    acc2 = None
    for dx in (-1, 0, 1):
        grp = None
        for dy in (-1, 0, 1):
            r = t1 + (dy + 1) * 3 + (dx + 1)
            term = xs[dy + 1] * p_ref[r:r + 1, :]
            grp = term if grp is None else grp + term
        grp = lane_roll(grp, cinit - dx * oup)
        acc2 = grp if acc2 is None else acc2 + grp
    x2 = jnp.maximum(acc2 * p_ref[t1 + 11:t1 + 12, :] + p_ref[t1 + 12:t1 + 13, :],
                     0.0)

    # x1 and x2 occupy disjoint lane slots -> single dense (R, L) store.
    # TODO(synk): bf16 I/O would halve HBM bytes on v6e/v7x; kept f32 here to
    # preserve the tight correctness tolerance.
    out_ref[...] = (x1 + x2).astype(out_ref.dtype)


def _build_lane_params(wp, wdw, sp, bp, sd, bd, W, oup):
    """Expand tiny per-channel weights into one packed per-lane array."""
    cin, cinit = wp.shape
    cnew = wdw.shape[2]
    L = W * oup
    lane = jnp.arange(L)
    jm = lane % oup                   # channel slot within a pixel
    wm = lane // oup                  # pixel (W coordinate)

    # 1x1 conv (OUTPUT positions): A[r, w*oup+j] = wp[j - t, j], t = r-(cin-1).
    t1 = cin + cinit - 1
    ts = jnp.arange(t1) - (cin - 1)
    c_idx = jm[None, :] - ts[:, None]
    valid1 = (jm[None, :] < cinit) & (c_idx >= 0) & (c_idx < cin)
    A = jnp.where(
        valid1,
        wp[jnp.clip(c_idx, 0, cin - 1), jnp.clip(jm, 0, cinit - 1)[None, :]],
        0.0).astype(jnp.float32)

    # depthwise 3x3 (SOURCE positions): B[(dy+1)*3+(dx+1), w*oup+j] =
    # wdw[dy+1, dx+1, j], masked so the later lane roll by cinit - dx*oup lands
    # exactly on valid x2 slots of in-range output pixels (w_out = wm - dx).
    j_live = jm < min(cinit, cnew, oup - cinit)
    j_safe = jnp.clip(jm, 0, cnew - 1)
    rows = []
    for dy in (-1, 0, 1):
        for dx in (-1, 0, 1):
            w_ok = (wm - dx >= 0) & (wm - dx < W)
            rows.append(jnp.where(j_live & w_ok, wdw[dy + 1, dx + 1, j_safe], 0.0))
    B = jnp.stack(rows, axis=0).astype(jnp.float32)

    # folded BN scale/shift per lane (zero outside the owning slots so that
    # ReLU keeps foreign slots exactly 0 -> the x1 + x2 slot-merge is exact).
    x1_slot = jm < cinit
    x2_slot = (jm >= cinit) & (jm - cinit < cnew)
    j1 = jnp.clip(jm, 0, cinit - 1)
    j2 = jnp.clip(jm - cinit, 0, cnew - 1)
    aff = jnp.stack([
        jnp.where(x1_slot, sp[j1], 0.0),
        jnp.where(x1_slot, bp[j1], 0.0),
        jnp.where(x2_slot, sd[j2], 0.0),
        jnp.where(x2_slot, bd[j2], 0.0),
    ], axis=0).astype(jnp.float32)

    return jnp.concatenate([A, B, aff], axis=0), t1


def ghost_module_pallas(x_nchw, wp, sp, bp, wdw, sd, bd, oup, *, target_rows=1024):
    """x_nchw: (N, Cin, H, W).  Returns (N, oup, H, W) to match PyTorch."""
    N, cin, H, W = x_nchw.shape
    cinit = wp.shape[1]
    cnew = wdw.shape[2]
    # TODO(synk): only ratio=2 (pure depthwise cheap_operation) and inp <= oup
    # are implemented; general grouped conv / wider inputs need a different
    # lane-slot layout.
    assert cnew == cinit, "only ratio=2 (depthwise) cheap_operation supported"
    assert cin <= oup, "lane layout assumes inp <= oup"
    L = W * oup

    # Lane-dense slab: channel c of pixel (h, w) of image n at row n*H + h,
    # lane w*oup + c.  All N*H image rows are stacked so blocks can be large.
    # TODO(synk): the NCHW<->slab transposes (and the oup-cin zero lanes) are
    # extra HBM round trips; accept/emit NHWC (or the slab layout) end-to-end
    # to drop them for production use.
    x_nhwc = jnp.transpose(x_nchw, (0, 2, 3, 1)).astype(jnp.float32)
    x_slab = jnp.pad(x_nhwc, ((0, 0), (0, 0), (0, 0), (0, oup - cin)))
    x_slab = x_slab.reshape(N * H, L)

    params, t1 = _build_lane_params(wp, wdw, sp, bp, sd, bd, W, oup)
    P = params.shape[0]

    # Row-chunk selection: blocks hold whole images (R multiple of H) so the
    # per-image row masks are exact and rolls never leak across images.  Aim
    # for ~target_rows rows per step but keep >= 2 grid steps when N allows
    # (v7x dual-TensorCore 'parallel' axis).
    total_rows = N * H
    ipb = max(1, min(N, target_rows // max(H, 1)))     # images per block
    if N >= 2:
        ipb = min(ipb, max(1, N // 2))
    while N % ipb != 0:
        ipb -= 1
    R = ipb * H
    if R % 8 != 0 and R != total_rows:
        ipb, R = N, total_rows                          # fallback: full-extent block
    grid = (N // ipb,)

    # VMEM budget: double-buffered in+out blocks plus the packed params,
    # with headroom; capped well below v7x's 64 MiB physical VMEM.
    block_bytes = R * L * 4
    vmem_limit = int(min(max(6 * block_bytes + 4 * P * L * 4, 16 * 1024 * 1024),
                         64 * 1024 * 1024))

    kernel = functools.partial(_ghost_kernel, cin=cin, cinit=cinit, oup=oup,
                               H=H, t1=t1)

    out_slab = pl.pallas_call(
        kernel,
        out_shape=jax.ShapeDtypeStruct((total_rows, L), jnp.float32),
        grid_spec=pltpu.PrefetchScalarGridSpec(
            num_scalar_prefetch=0,
            grid=grid,
            in_specs=[
                pl.BlockSpec((R, L), lambda i: (i, 0)),
                pl.BlockSpec((P, L), lambda i: (0, 0)),
            ],
            out_specs=pl.BlockSpec((R, L), lambda i: (i, 0)),
        ),
        compiler_params=pltpu.CompilerParams(
            dimension_semantics=("parallel",),
            vmem_limit_bytes=vmem_limit),
    )(x_slab, params)

    out_nhwc = out_slab.reshape(N, H, W, oup)
    return jnp.transpose(out_nhwc, (0, 3, 1, 2))


def ghost_module_ref(x_nchw, wp, sp, bp, wdw, sd, bd, oup):
    """Pure-JAX reference (same math) for the correctness check."""
    x = jnp.transpose(x_nchw, (0, 2, 3, 1)).astype(jnp.float32)  # NHWC
    x1 = jnp.maximum(
        jnp.einsum('nhwc,cd->nhwd', x, wp,
                   precision=lax.Precision.HIGHEST) * sp + bp, 0.0)
    xp = jnp.pad(x1, ((0, 0), (1, 1), (1, 1), (0, 0)))
    H, W = x.shape[1], x.shape[2]
    acc = jnp.zeros_like(x1)
    for dy in range(3):
        for dx in range(3):
            acc = acc + xp[:, dy:dy + H, dx:dx + W, :] * wdw[dy, dx, :]
    x2 = jnp.maximum(acc * sd + bd, 0.0)
    out = jnp.concatenate([x1, x2], axis=-1)[:, :, :, :oup]
    return jnp.transpose(out, (0, 3, 1, 2))


if __name__ == "__main__":
    # GhostModule(inp=4, oup=8, kernel_size=1, ratio=2, dw_size=3, stride=1, relu=True)
    inp, oup, ratio = 4, 8, 2
    init_channels = math.ceil(oup / ratio)          # 4
    new_channels = init_channels * (ratio - 1)      # 4
    N, H, W = 2, 16, 16
    eps = 1e-5

    key = jax.random.PRNGKey(0)
    k = jax.random.split(key, 8)

    x = jax.random.normal(k[0], (N, inp, H, W), dtype=jnp.float32)

    # primary conv: torch weight (init_channels, inp, 1, 1) -> (inp, init_channels)
    wp_t = 0.1 * jax.random.normal(k[1], (init_channels, inp, 1, 1), dtype=jnp.float32)
    wp = jnp.transpose(wp_t[:, :, 0, 0], (1, 0))

    # cheap op: torch weight (new_channels, 1, 3, 3), groups=init_channels
    # (ratio=2 => pure depthwise).  Rearranged to (3, 3, new_channels).
    wdw_t = 0.1 * jax.random.normal(k[2], (new_channels, 1, 3, 3), dtype=jnp.float32)
    wdw = jnp.transpose(wdw_t[:, 0, :, :], (1, 2, 0))

    # BatchNorm (eval mode, running_mean=0, running_var=1) folded into scale/shift.
    gamma_p = 1.0 + 0.1 * jax.random.normal(k[3], (init_channels,), dtype=jnp.float32)
    beta_p = 0.1 * jax.random.normal(k[4], (init_channels,), dtype=jnp.float32)
    gamma_d = 1.0 + 0.1 * jax.random.normal(k[5], (new_channels,), dtype=jnp.float32)
    beta_d = 0.1 * jax.random.normal(k[6], (new_channels,), dtype=jnp.float32)

    sp = gamma_p / jnp.sqrt(1.0 + eps)
    bp = beta_p
    sd = gamma_d / jnp.sqrt(1.0 + eps)
    bd = beta_d

    out = ghost_module_pallas(x, wp, sp, bp, wdw, sd, bd, oup)
    out = jax.block_until_ready(out)

    ref = ghost_module_ref(x, wp, sp, bp, wdw, sd, bd, oup)
    assert out.shape == (N, oup, H, W), out.shape
    max_err = float(jnp.max(jnp.abs(out - ref)))
    assert jnp.allclose(out, ref, atol=1e-4, rtol=1e-4), max_err

    print("KERNEL_OK")
</pallas_src>

<mosaic_0001>
module attributes {stable_mosaic.version = 11 : i64} {
  func.func @_ghost_kernel(%arg0: i32, %arg1: memref<16x128xf32, #tpu.memory_space<vmem>>, %arg2: memref<20x128xf32, #tpu.memory_space<vmem>>, %arg3: memref<16x128xf32, #tpu.memory_space<vmem>>) attributes {dimension_semantics = [#tpu.dimension_semantics<parallel>], iteration_bounds = array<i64: 2>, scalar_prefetch = 0 : i64, scratch_operands = 0 : i64, tpu.core_type = #tpu.core_type<tc>, window_params = [{transform_indices = @transform_0, window_bounds = array<i64: 16, 128>}, {pipeline_mode = #tpu.pipeline_mode<synchronous>, transform_indices = @transform_1, window_bounds = array<i64: 20, 128>}, {transform_indices = @transform_2, window_bounds = array<i64: 16, 128>}]} {
    %c0 = arith.constant 0 : index
    %c0_0 = arith.constant 0 : index
    %0 = vector.load %arg1[%c0, %c0_0] : memref<16x128xf32, #tpu.memory_space<vmem>>, vector<16x128xf32>
    %c3 = arith.constant 3 : index
    %c0_1 = arith.constant 0 : index
    %1 = vector.load %arg2[%c3, %c0_1] : memref<20x128xf32, #tpu.memory_space<vmem>>, vector<1x128xf32>
    %2 = vector.broadcast %1 : vector<1x128xf32> to vector<16x128xf32>
    %3 = arith.mulf %0, %2 : vector<16x128xf32>
    %c125_i32 = arith.constant 125 : i32
    %4 = tpu.dynamic_rotate %0 by %c125_i32 dim 1 : vector<16x128xf32>, i32 -> vector<16x128xf32>
    %c0_2 = arith.constant 0 : index
    %c0_3 = arith.constant 0 : index
    %5 = vector.load %arg2[%c0_2, %c0_3] : memref<20x128xf32, #tpu.memory_space<vmem>>, vector<1x128xf32>
    %6 = vector.broadcast %5 : vector<1x128xf32> to vector<16x128xf32>
    %7 = arith.mulf %4, %6 : vector<16x128xf32>
    %8 = arith.addf %3, %7 : vector<16x128xf32>
    %c126_i32 = arith.constant 126 : i32
    %9 = tpu.dynamic_rotate %0 by %c126_i32 dim 1 : vector<16x128xf32>, i32 -> vector<16x128xf32>
    %c1 = arith.constant 1 : index
    %c0_4 = arith.constant 0 : index
    %10 = vector.load %arg2[%c1, %c0_4] : memref<20x128xf32, #tpu.memory_space<vmem>>, vector<1x128xf32>
    %11 = vector.broadcast %10 : vector<1x128xf32> to vector<16x128xf32>
    %12 = arith.mulf %9, %11 : vector<16x128xf32>
    %13 = arith.addf %8, %12 : vector<16x128xf32>
    %c127_i32 = arith.constant 127 : i32
    %14 = tpu.dynamic_rotate %0 by %c127_i32 dim 1 : vector<16x128xf32>, i32 -> vector<16x128xf32>
    %c2 = arith.constant 2 : index
    %c0_5 = arith.constant 0 : index
    %15 = vector.load %arg2[%c2, %c0_5] : memref<20x128xf32, #tpu.memory_space<vmem>>, vector<1x128xf32>
    %16 = vector.broadcast %15 : vector<1x128xf32> to vector<16x128xf32>
    %17 = arith.mulf %14, %16 : vector<16x128xf32>
    %18 = arith.addf %13, %17 : vector<16x128xf32>
    %c1_i32 = arith.constant 1 : i32
    %19 = tpu.dynamic_rotate %0 by %c1_i32 dim 1 : vector<16x128xf32>, i32 -> vector<16x128xf32>
    %c4 = arith.constant 4 : index
    %c0_6 = arith.constant 0 : index
    %20 = vector.load %arg2[%c4, %c0_6] : memref<20x128xf32, #tpu.memory_space<vmem>>, vector<1x128xf32>
    %21 = vector.broadcast %20 : vector<1x128xf32> to vector<16x128xf32>
    %22 = arith.mulf %19, %21 : vector<16x128xf32>
    %23 = arith.addf %18, %22 : vector<16x128xf32>
    %c2_i32 = arith.constant 2 : i32
    %24 = tpu.dynamic_rotate %0 by %c2_i32 dim 1 : vector<16x128xf32>, i32 -> vector<16x128xf32>
    %c5 = arith.constant 5 : index
    %c0_7 = arith.constant 0 : index
    %25 = vector.load %arg2[%c5, %c0_7] : memref<20x128xf32, #tpu.memory_space<vmem>>, vector<1x128xf32>
    %26 = vector.broadcast %25 : vector<1x128xf32> to vector<16x128xf32>
    %27 = arith.mulf %24, %26 : vector<16x128xf32>
    %28 = arith.addf %23, %27 : vector<16x128xf32>
    %c3_i32 = arith.constant 3 : i32
    %29 = tpu.dynamic_rotate %0 by %c3_i32 dim 1 : vector<16x128xf32>, i32 -> vector<16x128xf32>
    %c6 = arith.constant 6 : index
    %c0_8 = arith.constant 0 : index
    %30 = vector.load %arg2[%c6, %c0_8] : memref<20x128xf32, #tpu.memory_space<vmem>>, vector<1x128xf32>
    %31 = vector.broadcast %30 : vector<1x128xf32> to vector<16x128xf32>
    %32 = arith.mulf %29, %31 : vector<16x128xf32>
    %33 = arith.addf %28, %32 : vector<16x128xf32>
    %c16 = arith.constant 16 : index
    %c0_9 = arith.constant 0 : index
    %34 = vector.load %arg2[%c16, %c0_9] : memref<20x128xf32, #tpu.memory_space<vmem>>, vector<1x128xf32>
    %35 = vector.broadcast %34 : vector<1x128xf32> to vector<16x128xf32>
    %36 = arith.mulf %33, %35 : vector<16x128xf32>
    %c17 = arith.constant 17 : index
    %c0_10 = arith.constant 0 : index
    %37 = vector.load %arg2[%c17, %c0_10] : memref<20x128xf32, #tpu.memory_space<vmem>>, vector<1x128xf32>
    %38 = vector.broadcast %37 : vector<1x128xf32> to vector<16x128xf32>
    %39 = arith.addf %36, %38 : vector<16x128xf32>
    %cst = arith.constant 0.000000e+00 : f32
    %40 = vector.broadcast %cst : f32 to vector<16x128xf32>
    %41 = arith.maximumf %39, %40 : vector<16x128xf32>
    %42 = tpu.iota {dimensions = array<i32: 0>} : vector<16x128xi32>
    %c16_i32 = arith.constant 16 : i32
    %c0_i32 = arith.constant 0 : i32
    %43 = arith.cmpi eq, %c16_i32, %c0_i32 : i32
    %c1_i32_11 = arith.constant 1 : i32
    %44 = arith.select %43, %c1_i32_11, %c16_i32 : i32
    %45 = vector.broadcast %44 : i32 to vector<16x128xi32>
    %46 = arith.remsi %42, %45 : vector<16x128xi32>
    %c0_i32_12 = arith.constant 0 : i32
    %47 = vector.broadcast %c0_i32_12 : i32 to vector<16x128xi32>
    %48 = arith.cmpi ne, %46, %47 : vector<16x128xi32>
    %c0_i32_13 = arith.constant 0 : i32
    %49 = vector.broadcast %c0_i32_13 : i32 to vector<16x128xi32>
    %50 = arith.cmpi slt, %46, %49 : vector<16x128xi32>
    %c0_i32_14 = arith.constant 0 : i32
    %51 = arith.cmpi slt, %44, %c0_i32_14 : i32
    %52 = vector.broadcast %51 : i1 to vector<16x128xi1>
    %53 = vector.broadcast %52 : vector<16x128xi1> to vector<16x128xi1>
    %54 = arith.xori %50, %53 : vector<16x128xi1>
    %55 = arith.andi %54, %48 : vector<16x128xi1>
    %56 = vector.broadcast %44 : i32 to vector<16x128xi32>
    %57 = arith.addi %46, %56 : vector<16x128xi32>
    %58 = arith.select %55, %57, %46 : vector<16x128xi1>, vector<16x128xi32>
    %c1_i32_15 = arith.constant 1 : i32
    %59 = vector.broadcast %c1_i32_15 : i32 to vector<16x128xi32>
    %60 = arith.cmpi sge, %58, %59 : vector<16x128xi32>
    %c1_i32_16 = arith.constant 1 : i32
    %61 = tpu.dynamic_rotate %41 by %c1_i32_16 dim 0 : vector<16x128xf32>, i32 -> vector<16x128xf32>
    %cst_17 = arith.constant 0.000000e+00 : f32
    %62 = vector.broadcast %cst_17 : f32 to vector<16x128xf32>
    %63 = arith.select %60, %61, %62 : vector<16x128xi1>, vector<16x128xf32>
    %c14_i32 = arith.constant 14 : i32
    %64 = vector.broadcast %c14_i32 : i32 to vector<16x128xi32>
    %65 = arith.cmpi sle, %58, %64 : vector<16x128xi32>
    %c15_i32 = arith.constant 15 : i32
    %66 = tpu.dynamic_rotate %41 by %c15_i32 dim 0 : vector<16x128xf32>, i32 -> vector<16x128xf32>
    %cst_18 = arith.constant 0.000000e+00 : f32
    %67 = vector.broadcast %cst_18 : f32 to vector<16x128xf32>
    %68 = arith.select %65, %66, %67 : vector<16x128xi1>, vector<16x128xf32>
    %c7 = arith.constant 7 : index
    %c0_19 = arith.constant 0 : index
    %69 = vector.load %arg2[%c7, %c0_19] : memref<20x128xf32, #tpu.memory_space<vmem>>, vector<1x128xf32>
    %70 = vector.broadcast %69 : vector<1x128xf32> to vector<16x128xf32>
    %71 = arith.mulf %63, %70 : vector<16x128xf32>
    %c10 = arith.constant 10 : index
    %c0_20 = arith.constant 0 : index
    %72 = vector.load %arg2[%c10, %c0_20] : memref<20x128xf32, #tpu.memory_space<vmem>>, vector<1x128xf32>
    %73 = vector.broadcast %72 : vector<1x128xf32> to vector<16x128xf32>
    %74 = arith.mulf %41, %73 : vector<16x128xf32>
    %75 = arith.addf %71, %74 : vector<16x128xf32>
    %c13 = arith.constant 13 : index
    %c0_21 = arith.constant 0 : index
    %76 = vector.load %arg2[%c13, %c0_21] : memref<20x128xf32, #tpu.memory_space<vmem>>, vector<1x128xf32>
    %77 = vector.broadcast %76 : vector<1x128xf32> to vector<16x128xf32>
    %78 = arith.mulf %68, %77 : vector<16x128xf32>
    %79 = arith.addf %75, %78 : vector<16x128xf32>
    %c12_i32 = arith.constant 12 : i32
    %80 = tpu.dynamic_rotate %79 by %c12_i32 dim 1 : vector<16x128xf32>, i32 -> vector<16x128xf32>
    %c8 = arith.constant 8 : index
    %c0_22 = arith.constant 0 : index
    %81 = vector.load %arg2[%c8, %c0_22] : memref<20x128xf32, #tpu.memory_space<vmem>>, vector<1x128xf32>
    %82 = vector.broadcast %81 : vector<1x128xf32> to vector<16x128xf32>
    %83 = arith.mulf %63, %82 : vector<16x128xf32>
    %c11 = arith.constant 11 : index
    %c0_23 = arith.constant 0 : index
    %84 = vector.load %arg2[%c11, %c0_23] : memref<20x128xf32, #tpu.memory_space<vmem>>, vector<1x128xf32>
    %85 = vector.broadcast %84 : vector<1x128xf32> to vector<16x128xf32>
    %86 = arith.mulf %41, %85 : vector<16x128xf32>
    %87 = arith.addf %83, %86 : vector<16x128xf32>
    %c14 = arith.constant 14 : index
    %c0_24 = arith.constant 0 : index
    %88 = vector.load %arg2[%c14, %c0_24] : memref<20x128xf32, #tpu.memory_space<vmem>>, vector<1x128xf32>
    %89 = vector.broadcast %88 : vector<1x128xf32> to vector<16x128xf32>
    %90 = arith.mulf %68, %89 : vector<16x128xf32>
    %91 = arith.addf %87, %90 : vector<16x128xf32>
    %c4_i32 = arith.constant 4 : i32
    %92 = tpu.dynamic_rotate %91 by %c4_i32 dim 1 : vector<16x128xf32>, i32 -> vector<16x128xf32>
    %93 = arith.addf %80, %92 : vector<16x128xf32>
    %c9 = arith.constant 9 : index
    %c0_25 = arith.constant 0 : index
    %94 = vector.load %arg2[%c9, %c0_25] : memref<20x128xf32, #tpu.memory_space<vmem>>, vector<1x128xf32>
    %95 = vector.broadcast %94 : vector<1x128xf32> to vector<16x128xf32>
    %96 = arith.mulf %63, %95 : vector<16x128xf32>
    %c12 = arith.constant 12 : index
    %c0_26 = arith.constant 0 : index
    %97 = vector.load %arg2[%c12, %c0_26] : memref<20x128xf32, #tpu.memory_space<vmem>>, vector<1x128xf32>
    %98 = vector.broadcast %97 : vector<1x128xf32> to vector<16x128xf32>
    %99 = arith.mulf %41, %98 : vector<16x128xf32>
    %100 = arith.addf %96, %99 : vector<16x128xf32>
    %c15 = arith.constant 15 : index
    %c0_27 = arith.constant 0 : index
    %101 = vector.load %arg2[%c15, %c0_27] : memref<20x128xf32, #tpu.memory_space<vmem>>, vector<1x128xf32>
    %102 = vector.broadcast %101 : vector<1x128xf32> to vector<16x128xf32>
    %103 = arith.mulf %68, %102 : vector<16x128xf32>
    %104 = arith.addf %100, %103 : vector<16x128xf32>
    %c124_i32 = arith.constant 124 : i32
    %105 = tpu.dynamic_rotate %104 by %c124_i32 dim 1 : vector<16x128xf32>, i32 -> vector<16x128xf32>
    %106 = arith.addf %93, %105 : vector<16x128xf32>
    %c18 = arith.constant 18 : index
    %c0_28 = arith.constant 0 : index
    %107 = vector.load %arg2[%c18, %c0_28] : memref<20x128xf32, #tpu.memory_space<vmem>>, vector<1x128xf32>
    %108 = vector.broadcast %107 : vector<1x128xf32> to vector<16x128xf32>
    %109 = arith.mulf %106, %108 : vector<16x128xf32>
    %c19 = arith.constant 19 : index
    %c0_29 = arith.constant 0 : index
    %110 = vector.load %arg2[%c19, %c0_29] : memref<20x128xf32, #tpu.memory_space<vmem>>, vector<1x128xf32>
    %111 = vector.broadcast %110 : vector<1x128xf32> to vector<16x128xf32>
    %112 = arith.addf %109, %111 : vector<16x128xf32>
    %cst_30 = arith.constant 0.000000e+00 : f32
    %113 = vector.broadcast %cst_30 : f32 to vector<16x128xf32>
    %114 = arith.maximumf %112, %113 : vector<16x128xf32>
    %115 = arith.addf %41, %114 : vector<16x128xf32>
    %c0_31 = arith.constant 0 : index
    %c0_32 = arith.constant 0 : index
    %116 = vector.load %arg3[%c0_31, %c0_32] : memref<16x128xf32, #tpu.memory_space<vmem>>, vector<16x128xf32>
    tpu.vector_store %arg3[%c0_31, %c0_32], %115 {strides = array<i32>} : memref<16x128xf32, #tpu.memory_space<vmem>>, vector<16x128xf32>,
    return
  }
  func.func @transform_0(%arg0: i32) -> (i32, i32) {
    %c0_i32 = arith.constant 0 : i32
    %c0_i32_0 = arith.constant 0 : i32
    return %arg0, %c0_i32 : i32, i32
  }
  func.func @transform_1(%arg0: i32) -> (i32, i32) {
    %c0_i32 = arith.constant 0 : i32
    %c0_i32_0 = arith.constant 0 : i32
    %c0_i32_1 = arith.constant 0 : i32
    return %c0_i32, %c0_i32_0 : i32, i32
  }
  func.func @transform_2(%arg0: i32) -> (i32, i32) {
    %c0_i32 = arith.constant 0 : i32
    %c0_i32_0 = arith.constant 0 : i32
    return %arg0, %c0_i32 : i32, i32
  }
}

</mosaic_0001>

<bundles_post_ra>
// kernel: tpu_custom_call.1
= control target key start
LH: loop header
LB: loop body
LE: loop exit
PB: predicated region body
PF: predicated region fallthrough
CT: control target
= control target key end

     0   :  { %7 = vsyncpa [#allocation3], 0  ;;  %s1039_s0 = inlined_call_operand.hbm [shape: f32[32,128], index: 0, kind: input, shape index: {}]   ;;  %s1040_s1 = inlined_call_operand.hbm [shape: f32[20,128], index: 1, kind: input, shape index: {}]   ;;  %s1041_s2 = inlined_call_operand.hbm [shape: f32[32,128], index: 2, kind: output, shape index: {}]  }
   0x1   :  { %9 = vsyncpa [#allocation3 + $0x1], 0 }
   0x2   :  { %10 = vsyncpa [#allocation6], 0 }
   0x3   :  { %11 = vsyncpa [#allocation4], 0 }
   0x4   :  { %13 = vsyncpa [#allocation4 + $0x1], 0  ;;  %s804_s9 = smov 0   ;;  %s806_s10 = smov 0  }
   0x5   :  { %s808_s11 = smov 0   ;;  %s810_s12 = smov 0  }
   0x6 LB: > { %s825_s13 = sadd.s32 4294967295, %s771_s12   ;;  %s535_s14 = sadd.s32 4294967294, %s771_s12   ;;  %s771_s12 = sphi %s810_s12, %s1063_s12   ;;  %s767_s11 = sphi %s808_s11, %s1062_s11   ;;  %s763_s10 = sphi %s806_s10, %s1061_s10   ;;  %s759_s9 = sphi %s804_s9, %s1060_s9  }
   0x7   : > { %p39_p0 = scmp.ne.s32.totalorder %s763_s10, %s759_s9  ;;  %p1042_p1 = scmp.eq.s32.totalorder %s825_s13, 0 }
   0x8   : > { %p90_p3 = scmp.eq.s32.totalorder %s535_s14, 1  ;;  %p536_p5 = scmp.ge.s32.totalorder %s771_s12, 1 }
   0x9   : > { %p834_p4 = por %p1042_p1, %p39_p0  ;;  %p97_p7 = scmp.lt.s32.totalorder %s771_s12, 3 }
   0xa   : > { %p839_p6 = por %p90_p3, %p39_p0  ;;  %s773_s18 = smov [#allocation5]  }
   0xb   : > { %s1045_s15 = scalar_select %p834_p4, 1, 0 }
   0xc   : > { %s1046_s16 = scalar_select %p839_p6, 1, 0 }
   0xd   : > { %p844_p8 = pnand %p536_p5, %p97_p7  ;;  %s109_s19 = sshll.u32 %s773_s18, 4  ;;  %s848_s19 = int_to_ptr.vmem [resolvable:$true] %s109_s19 }
   0xe   : > { %s860_s21 = sadd.s32 1, %s771_s12   ;;  %s26_s22 = sadd.s32 1, %s767_s11 }
   0xf   : > { %s1047_s17 = scalar_select %p844_p8, 1, 0 }
  0x10   : > { %p581_p9 = pneg %p844_p8  ;;  %s23_s23 = ssub.s32 %s771_s12, %s860_s21 }
  0x11   : > { %s643_s26 = scalar_lea.hbm %s1040_s1, 384 }
  0x12   : > { %p855_p11 = pnand %p581_p9, %p1042_p1  ;;  %p644_p12 = scmp.ne.s32.totalorder %s1040_s1, %s643_s26 }
  0x13   : > { %p650_p5 = scmp.lt.u32.totalorder %s643_s26, %s1040_s1 }
  0x14   : > { %p645_p13 = pneg %p855_p11 }
  0x16   : > { %p646_p0 = pnand %p645_p13, %p644_p12 }
  0x18   : > { %p647_p3 = pneg %p646_p0 }
  0x1a   : > { %p652_p7 = pnand %p650_p5, %p647_p3 }
  0x1c   : > { %655 = shalt.err (!%p652_p7)
}
  0x1d   : > { %s656_s3 = scalar_lea.vmem %s848_s19, 384  ;;  %p664_p2 = scmp.lt.s32.totalorder %s848_s19, %s848_s19 }
  0x1e   : > { %p657_p9 = scmp.ne.s32.totalorder %s848_s19, %s656_s3  ;;  %p665_p6 = scmp.lt.s32.totalorder %s656_s3, %s656_s3 }
  0x20   : > { %p659_p10 = pnand %p657_p9, %p645_p13  ;;  %p666_p4 = por %p665_p6, %p664_p2 }
  0x22   : > { %p660_p1 = pneg %p659_p10 }
  0x24   : > { %p667_p8 = pnand %p666_p4, %p660_p1 }
  0x26   : > { %670 = shalt.err (!%p667_p8)
}
  0x27   : > { %s774_s4 = smov 128   ;;  %s775_s5 = smov 8  }
  0x28   : > { %584 = dma.hbm_to_vmem [thread:$0]  (!%p855_p11), %s1040_s1, 384, %s848_s19, [#allocation6], %s774_s4, %s774_s4, %s775_s5  }
  0x29   : > { %p24_p1 = scmp.eq.s32.totalorder %s23_s23, 0  ;;  %p33_p2 = scmp.ne.s32.totalorder %s767_s11, %s763_s10 }
  0x2a   : > { %p34_p4 = scmp.eq.s32.totalorder %s771_s12, 0  ;;  %p594_p6 = scmp.lt.s32.totalorder %s771_s12, 2 }
  0x2b   : > { %s894_s8 = scalar_select %p24_p1, %s767_s11, %s26_s22  }
  0x2c   : > { %p35_p8 = por %p34_p4, %p33_p2  ;;  %p1049_p10 = scmp.eq.s32.totalorder %s825_s13, 1 }
  0x2d   : > { %s123_s18 = sand.u32 1, %s767_s11   ;;  %s571_s20 = sshll.u32 %s771_s12, 8 }
  0x2e   : > { %p898_p12 = por %p1049_p10, %p33_p2  ;;  %s539_s24 = sshll.u32 %s123_s18, 4 }
  0x2f   : > { %s907_s27 = scalar_lea.hbm %s1039_s0, %s571_s20  ;;  %s127_s19 = scalar_lea.vmem [#allocation2], %s539_s24 }
  0x30   : > { %s134_s22 = sshll.u32 %s127_s19, 4  ;;  %p909_p11 = pnand %p594_p6, %p35_p8  ;;  %s913_s22 = int_to_ptr.vmem [resolvable:$true] %s134_s22 }
  0x31   : > { %s915_s28 = scalar_lea.sflag [#allocation3], %s123_s18  ;;  %s671_s29 = scalar_lea.hbm %s907_s27, 256 }
  0x32   : > { %p672_p13 = scmp.ne.s32.totalorder %s907_s27, %s671_s29  ;;  %p673_p0 = pneg %p909_p11 }
  0x33   : > { %s676_s6 = scalar_lea.hbm %s1039_s0, 512  ;;  %p677_p7 = scmp.lt.u32.totalorder %s907_s27, %s1039_s0 }
  0x34   : > { %p674_p3 = pnand %p673_p0, %p672_p13  ;;  %p678_p9 = scmp.lt.u32.totalorder %s676_s6, %s671_s29 }
  0x35   : > { %p680_p2 = scmp.lt.u32.totalorder %s671_s29, %s907_s27 }
  0x36   : > { %p675_p5 = pneg %p674_p3  ;;  %p679_p1 = por %p678_p9, %p677_p7 }
  0x38   : > { %p681_p4 = por %p680_p2, %p679_p1 }
  0x3a   : > { %p682_p6 = pnand %p681_p4, %p675_p5 }
  0x3c   : > { %685 = shalt.err (!%p682_p6)
}
  0x3d   : > { %s686_s18 = scalar_lea.vmem %s913_s22, 256  ;;  %s776_s24 = smov [#allocation2]  }
  0x3e   : > { %p687_p8 = scmp.ne.s32.totalorder %s913_s22, %s686_s18  ;;  %s691_s25 = sshll.u32 %s776_s24, 4  ;;  %s692_s25 = int_to_ptr.vmem [resolvable:$false] %s691_s25 }
  0x3f   : > { %s693_s26 = scalar_lea.vmem %s692_s25, 512  ;;  %p694_p3 = scmp.lt.s32.totalorder %s913_s22, %s692_s25 }
  0x40   : > { %p689_p10 = pnand %p687_p8, %p673_p0  ;;  %p695_p7 = scmp.lt.s32.totalorder %s693_s26, %s686_s18 }
  0x42   : > { %p690_p13 = pneg %p689_p10  ;;  %p696_p9 = por %p695_p7, %p694_p3 }
  0x44   : > { %p697_p1 = pnand %p696_p9, %p690_p13 }
  0x46   : > { %700 = shalt.err (!%p697_p1)
}
  0x47   : > { %588 = dma.hbm_to_vmem [thread:$0]  (!%p909_p11), %s907_s27, 256, %s913_s22, %s915_s28, %s774_s4, %s774_s4, %s775_s5  }
  0x48   : > { %p1052_p0 = scmp.ne.s32.totalorder %s1047_s17, 0 }
  0x49   : > { %s949_s19 = sand.u32 (!%p1052_p0), 1, %s763_s10   ;;  %p1053_p5 = scmp.ne.s32.totalorder (!%p1052_p0), %s1045_s15, 0 }
  0x4a   : > { %146 = sbr.rel (%p1052_p0) target bundleno = 389 (0x185), region = 28  ;;  %s543_s29 = sshll.u32 (!%p1052_p0), %s949_s19, 4 }
  0x4b   : > { %s149_s30 = scalar_lea.sflag (!%p1052_p0), [#allocation3], %s949_s19  ;;  %s152_s23 = scalar_lea.vmem (!%p1052_p0), [#allocation2], %s543_s29 }
  0x51   : > { %746 = dma.done.wait (%p1053_p5), %s149_s30, 256  }
  0x52   : > { %748 = vsyncadd (%p1053_p5), %s149_s30, 4294967040  ;;  %p1054_p11 = scmp.eq.s32.totalorder %s825_s13, 0 }
  0x54   : > { %750 = dma.done.wait (%p1054_p11), [#allocation6], 384   ;;  %p1055_p2 = pmov %p1054_p11 }
  0x55   : > { %v179_v0 = vld [vmem:[%s152_s23] sm:$0xff]  ;;  %s777_s17 = smov 126   ;;  %s778_s4 = smov 125   ;;  %v180_v1 = vld [vmem:[%s152_s23 + $0x8] sm:$0xff]  ;;  %v282_v27 = vlaneseq }
  0x56   : > { %752 = vsyncadd (%p1055_p2), [#allocation6], 4294966912  ;;  %201 = vrot.lane.b32.xlu1 %v179_v0, %s777_s17  ;;  %188 = vrot.lane.b32.xlu0 %v179_v0, %s778_s4  ;;  %s779_s5 = smov 127   ;;  %s780_s27 = smov 1   ;;  %v546_v4 = vld [vmem:[#allocation5 + $0x3] ss:$0 sm:$0xff] }
  0x57   : > { %s781_s15 = smov 2   ;;  %s782_s22 = smov 3   ;;  %v547_v5 = vld [vmem:[#allocation5] ss:$0 sm:$0xff]  ;;  %v187_v8 = vmul.f32 %v546_v4, %v180_v1  ;;  %v186_v10 = vmul.f32 %v546_v4, %v179_v0  ;;  %v548_v15 = vld [vmem:[#allocation5 + $0x1] ss:$0 sm:$0xff] }
  0x58   : > { %v549_v16 = vld [vmem:[#allocation5 + $0x2] ss:$0 sm:$0xff]  ;;  %v550_v19 = vld [vmem:[#allocation5 + $0x4] ss:$0 sm:$0xff]  ;;  %v551_v26 = vld [vmem:[#allocation5 + $0x5] ss:$0 sm:$0xff] }
  0x59   : > { %v552_v37 = vld [vmem:[#allocation5 + $0x6] ss:$0 sm:$0xff]  ;;  %v283_v38 = vshrl.u32 %v282_v27, 7  ;;  %v553_v47 = vld [vmem:[#allocation5 + $0x10] ss:$0 sm:$0xff]  ;;  %s783_s28 = smov 12  }
  0x5a   : > { %203 = vrot.lane.b32.xlu1 %v180_v1, %s777_s17  ;;  %190 = vrot.lane.b32.xlu0 %v180_v1, %s778_s4  ;;  %v554_v51 = vld [vmem:[#allocation5 + $0x11] ss:$0 sm:$0xff]  ;;  %v556_v61 = vld [vmem:[#allocation5 + $0xa] ss:$0 sm:$0xff]  ;;  %v558_v4 = vld [vmem:[#allocation5 + $0x8] ss:$0 sm:$0xff] }
  0x5b   : > { %v284_v48 = vadd.s32 8, %v283_v38  ;;  %v289_v55 = vand.u32 15, %v283_v38  ;;  %vm313_vm0 = vcmp.lt.s32.totalorder %v283_v38, 1  ;;  %vm322_vm2 = vcmp.lt.s32.totalorder %v283_v38, 7  ;;  %s784_s3 = smov 4   ;;  %s785_s6 = smov 124  }
  0x5c   : > { %s572_s7 = sshll.u32 %s825_s13, 8  ;;  %s176_s20 = scalar_lea.vmem [#allocation7], %s543_s29 }
  0x5d   : > { %v296_v54 = vand.u32 15, %v284_v48  ;;  %vm309_vm3 = vcmp.ge.s32.totalorder %v289_v55, 1  ;;  %s452_s18 = sshll.u32 %s176_s20, 4  ;;  %s992_s26 = scalar_lea.hbm %s1041_s2, %s572_s7  ;;  %s994_s18 = int_to_ptr.vmem [resolvable:$true] %s452_s18 }
  0x5e   : > { %216 = vrot.lane.b32.xlu1 %v180_v1, %s779_s5  ;;  %214 = vrot.lane.b32.xlu0 %v179_v0, %s779_s5  ;;  %s439_s13 = scalar_lea.sflag [#allocation4], %s949_s19  ;;  %s701_s29 = scalar_lea.vmem %s994_s18, 256 }
  0x5f   : > { %vm967_vm1 = vcmp.le.s32.totalorder %v296_v54, 14  ;;  %p702_p4 = scmp.ne.s32.totalorder %s994_s18, %s701_s29  ;;  %s786_s30 = smov [#allocation7]  }
  0x60   : > { %s705_s23 = sshll.u32 %s786_s30, 4  ;;  %s706_s23 = int_to_ptr.vmem [resolvable:$false] %s705_s23 }
  0x61   : > { %p703_p6 = pnand %p702_p4, %p898_p12  ;;  %s707_s17 = scalar_lea.vmem %s706_s23, 512 }
  0x62   : > { %229 = vrot.lane.b32.xlu1 %v180_v1, %s780_s27  ;;  %227 = vrot.lane.b32.xlu0 %v179_v0, %s780_s27  ;;  %p708_p10 = scmp.lt.s32.totalorder %s994_s18, %s706_s23  ;;  %p709_p13 = scmp.lt.s32.totalorder %s707_s17, %s701_s29 }
  0x63   : > { %p704_p8 = pneg %p703_p6 }
  0x64   : > { %p710_p3 = por %p709_p13, %p708_p10 }
  0x66   : > { %242 = vrot.lane.b32.xlu1 %v180_v1, %s781_s15  ;;  %240 = vrot.lane.b32.xlu0 %v179_v0, %s781_s15  ;;  %p711_p7 = pnand %p710_p3, %p704_p8 }
  0x6a   : > { %255 = vrot.lane.b32.xlu1 %v180_v1, %s782_s22  ;;  %253 = vrot.lane.b32.xlu0 %v179_v0, %s782_s22 }
  0xc8   : > { %v202_v2 = vpop.permute.xlu1 %201  ;;  %v189_v3 = vpop.permute.xlu0 %188 }
  0xc9   : > { %v197_v11 = vmul.f32 %v547_v5, %v189_v3  ;;  %v210_v22 = vmul.f32 %v548_v15, %v202_v2  ;;  %v555_v2 = vld [vmem:[#allocation5 + $0x7] ss:$0 sm:$0xff]  ;;  %v557_v3 = vld [vmem:[#allocation5 + $0xd] ss:$0 sm:$0xff] }
  0xcb   : > { %v199_v17 = vadd.f32 %v197_v11, %v186_v10 }
  0xcc   : > { %v204_v6 = vpop.permute.xlu1 %203  ;;  %v191_v7 = vpop.permute.xlu0 %190 }
  0xcd   : > { %v198_v9 = vmul.f32 %v547_v5, %v191_v7  ;;  %v211_v18 = vmul.f32 %v548_v15, %v204_v6  ;;  %v212_v28 = vadd.f32 %v210_v22, %v199_v17 }
  0xcf   : > { %v200_v14 = vadd.f32 %v198_v9, %v187_v8  ;;  %v559_v9 = vld [vmem:[#allocation5 + $0xb] ss:$0 sm:$0xff] }
  0xd0   : > { %v217_v12 = vpop.permute.xlu1 %216  ;;  %v215_v13 = vpop.permute.xlu0 %214 }
  0xd1   : > { %v213_v23 = vadd.f32 %v211_v18, %v200_v14  ;;  %v224_v24 = vmul.f32 %v549_v16, %v217_v12  ;;  %v223_v25 = vmul.f32 %v549_v16, %v215_v13  ;;  %v560_v18 = vld [vmem:[#allocation5 + $0xe] ss:$0 sm:$0xff] }
  0xd3   : > { %v226_v33 = vadd.f32 %v224_v24, %v213_v23  ;;  %v225_v34 = vadd.f32 %v223_v25, %v212_v28 }
  0xd4   : > { %v230_v20 = vpop.permute.xlu1 %229  ;;  %v228_v21 = vpop.permute.xlu0 %227 }
  0xd5   : > { %v237_v29 = vmul.f32 %v550_v19, %v230_v20  ;;  %v236_v30 = vmul.f32 %v550_v19, %v228_v21  ;;  %v561_v19 = vld [vmem:[#allocation5 + $0x9] ss:$0 sm:$0xff] }
  0xd7   : > { %v239_v39 = vadd.f32 %v237_v29, %v226_v33  ;;  %v238_v40 = vadd.f32 %v236_v30, %v225_v34  ;;  %v563_v33 = vld [vmem:[#allocation5 + $0xf] ss:$0 sm:$0xff] }
  0xd8   : > { %v243_v31 = vpop.permute.xlu1 %242  ;;  %v241_v32 = vpop.permute.xlu0 %240 }
  0xd9   : > { %v250_v35 = vmul.f32 %v551_v26, %v243_v31  ;;  %v249_v36 = vmul.f32 %v551_v26, %v241_v32  ;;  %v562_v26 = vld [vmem:[#allocation5 + $0xc] ss:$0 sm:$0xff] }
  0xdb   : > { %v252_v43 = vadd.f32 %v250_v35, %v239_v39  ;;  %v251_v44 = vadd.f32 %v249_v36, %v238_v40 }
  0xdc   : > { %v256_v41 = vpop.permute.xlu1 %255  ;;  %v254_v42 = vpop.permute.xlu0 %253 }
  0xdd   : > { %v263_v45 = vmul.f32 %v552_v37, %v256_v41  ;;  %v262_v46 = vmul.f32 %v552_v37, %v254_v42 }
  0xdf   : > { %v265_v49 = vadd.f32 %v263_v45, %v252_v43  ;;  %v264_v50 = vadd.f32 %v262_v46, %v251_v44 }
  0xe1   : > { %v272_v52 = vmul.f32 %v553_v47, %v265_v49  ;;  %v271_v53 = vmul.f32 %v553_v47, %v264_v50 }
  0xe3   : > { %v279_v56 = vadd.f32 %v554_v51, %v272_v52  ;;  %v278_v57 = vadd.f32 %v554_v51, %v271_v53  ;;  %v564_v52 = vld [vmem:[#allocation5 + $0x12] ss:$0 sm:$0xff] }
  0xe5   : > { %v963_v58 = vmax.f32 %v279_v56, 0.0  ;;  %v965_v59 = vmax.f32 %v278_v57, 0.0  ;;  %v565_v56 = vld [vmem:[#allocation5 + $0x13] ss:$0 sm:$0xff] }
  0xe7   : > { %v311_v62 = vrot.slane %v965_v59, 7  ;;  %v312_v63 = vrot.slane %v963_v58, 7  ;;  %v320_v0 = vrot.slane %v965_v59, 1  ;;  %v321_v1 = vrot.slane %v963_v58, 1 }
  0xe8   : > { %v340_v7 = vmul.f32 %v556_v61, %v963_v58  ;;  %v339_v16 = vmul.f32 %v556_v61, %v965_v59  ;;  %v369_v21 = vmul.f32 %v559_v9, %v963_v58  ;;  %v368_v25 = vmul.f32 %v559_v9, %v965_v59 }
  0xe9   : > { %v314_v5 = vsel %vm313_vm0, %v311_v62, %v312_v63  ;;  %v324_v6 = vsel %vm322_vm2, %v321_v1, %v320_v0  ;;  %v315_v8 = vsel %vm313_vm0, %v312_v63, %v311_v62  ;;  %v323_v13 = vsel %vm322_vm2, %v320_v0, %v321_v1 }
  0xea   : > { %v326_v10 = vsel %vm967_vm1, %v324_v6, 0.0  ;;  %v333_v11 = vmul.f32 %v555_v2, %v314_v5  ;;  %v316_v12 = vsel %vm309_vm3, %v315_v8, 0.0  ;;  %v362_v17 = vmul.f32 %v558_v4, %v314_v5 }
  0xeb   : > { %v349_v14 = vmul.f32 %v557_v3, %v326_v10  ;;  %v332_v15 = vmul.f32 %v555_v2, %v316_v12  ;;  %v361_v22 = vmul.f32 %v558_v4, %v316_v12  ;;  %v348_v24 = vmul.f32 %v557_v3, %v323_v13 }
  0xec   : > { %v342_v20 = vadd.f32 %v340_v7, %v333_v11  ;;  %v371_v28 = vadd.f32 %v369_v21, %v362_v17  ;;  %v378_v29 = vmul.f32 %v560_v18, %v326_v10  ;;  %v393_v30 = vmul.f32 %v561_v19, %v314_v5 }
  0xed   : > { %v341_v23 = vadd.f32 %v339_v16, %v332_v15  ;;  %v370_v32 = vadd.f32 %v368_v25, %v361_v22  ;;  %v392_v34 = vmul.f32 %v561_v19, %v316_v12  ;;  %v400_v35 = vmul.f32 %v562_v26, %v963_v58 }
  0xee   : > { %v351_v27 = vadd.f32 %v349_v14, %v342_v20  ;;  %v377_v36 = vmul.f32 %v560_v18, %v323_v13  ;;  %v399_v37 = vmul.f32 %v562_v26, %v965_v59  ;;  %v380_v38 = vadd.f32 %v378_v29, %v371_v28 }
  0xef   : > { %v350_v31 = vadd.f32 %v348_v24, %v341_v23  ;;  %v402_v39 = vadd.f32 %v400_v35, %v393_v30  ;;  %v409_v40 = vmul.f32 %v563_v33, %v326_v10  ;;  %v408_v43 = vmul.f32 %v563_v33, %v323_v13 }
  0xf0   : > { %354 = vrot.lane.b32.xlu1 %v351_v27, %s783_s28  ;;  %v379_v41 = vadd.f32 %v377_v36, %v370_v32  ;;  %v401_v42 = vadd.f32 %v399_v37, %v392_v34 }
  0xf1   : > { %352 = vrot.lane.b32.xlu0 %v350_v31, %s783_s28  ;;  %v411_v44 = vadd.f32 %v409_v40, %v402_v39 }
  0xf2   : > { %v410_v45 = vadd.f32 %v408_v43, %v401_v42 }
  0xf4   : > { %383 = vrot.lane.b32.xlu1 %v380_v38, %s784_s3 }
  0xf5   : > { %381 = vrot.lane.b32.xlu0 %v379_v41, %s784_s3 }
  0xf8   : > { %414 = vrot.lane.b32.xlu1 %v411_v44, %s785_s6 }
  0xf9   : > { %412 = vrot.lane.b32.xlu0 %v410_v45, %s785_s6 }
 0x162   : > { %v355_v46 = vpop.permute.xlu1 %354 }
 0x163   : > { %v353_v47 = vpop.permute.xlu0 %352 }
 0x166   : > { %v384_v48 = vpop.permute.xlu1 %383 }
 0x167   : > { %v382_v49 = vpop.permute.xlu0 %381  ;;  %v386_v50 = vadd.f32 %v384_v48, %v355_v46 }
 0x168   : > { %v385_v51 = vadd.f32 %v382_v49, %v353_v47 }
 0x16a   : > { %v415_v53 = vpop.permute.xlu1 %414 }
 0x16b   : > { %v417_v54 = vadd.f32 %v415_v53, %v386_v50  ;;  %v413_v55 = vpop.permute.xlu0 %412 }
 0x16c   : > { %v416_v57 = vadd.f32 %v413_v55, %v385_v51 }
 0x16d   : > { %v424_v60 = vmul.f32 %v564_v52, %v417_v54 }
 0x16e   : > { %v423_v61 = vmul.f32 %v564_v52, %v416_v57 }
 0x16f   : > { %v431_v62 = vadd.f32 %v565_v56, %v424_v60 }
 0x170   : > { %v430_v63 = vadd.f32 %v565_v56, %v423_v61 }
 0x171   : > { %v433_v0 = vmax.f32 %v431_v62, 0.0 }
 0x172   : > { %v432_v1 = vmax.f32 %v430_v63, 0.0 }
 0x173   : > { %v435_v2 = vadd.f32 %v433_v0, %v963_v58 }
 0x174   : > { %v434_v3 = vadd.f32 %v432_v1, %v965_v59 }
 0x175   : > { %437 = vst [vmem:[%s176_s20 + $0x8] sm:$0xff] %v435_v2 }
 0x176   : > { %436 = vst [vmem:[%s176_s20] sm:$0xff] %v434_v3 }
 0x177   : > { %714 = shalt.err (!%p711_p7)
}
 0x178   : > { %s715_s4 = scalar_lea.hbm %s992_s26, 256  ;;  %s719_s15 = scalar_lea.hbm %s1041_s2, 512 }
 0x179   : > { %p716_p9 = scmp.ne.s32.totalorder %s992_s26, %s715_s4  ;;  %p720_p5 = scmp.lt.u32.totalorder %s992_s26, %s1041_s2 }
 0x17a   : > { %p721_p11 = scmp.lt.u32.totalorder %s719_s15, %s715_s4  ;;  %p723_p4 = scmp.lt.u32.totalorder %s715_s4, %s992_s26 }
 0x17b   : > { %p717_p1 = pnand %p716_p9, %p898_p12 }
 0x17c   : > { %p722_p2 = por %p721_p11, %p720_p5 }
 0x17d   : > { %p718_p0 = pneg %p717_p1 }
 0x17e   : > { %p724_p6 = por %p723_p4, %p722_p2 }
 0x180   : > { %p725_p8 = pnand %p724_p6, %p718_p0 }
 0x182   : > { %728 = shalt.err (!%p725_p8)
}
 0x183   : > { %s787_s3 = smov 128   ;;  %s788_s6 = smov 8  }
 0x184   : > { %579 = dma.vmem_to_hbm [thread:$0]  (%p898_p12), %s994_s18, 256, %s992_s26, %s439_s13, %s787_s3, %s787_s3, %s788_s6  }
 0x185 PF: > { %s467_s7 = sand.u32 1, %s759_s9   ;;  %p1058_p10 = scmp.ne.s32.totalorder %s1046_s16, 0 }
 0x186   : > { %p1059_p13 = scmp.ge.s32.totalorder %s771_s12, 2  ;;  %s468_s20 = scalar_lea.sflag [#allocation4], %s467_s7 }
 0x188   : > { %p590_p3 = pnand %p1059_p13, %p1058_p10 }
 0x18a   : > { %754 = dma.done.wait (!%p590_p3), %s468_s20, 256  }
 0x18b   : > { %756 = vsyncadd (!%p590_p3), %s468_s20, 4294967040  ;;  %p16_p7 = scmp.ge.s32.totalorder %s860_s21, 4   ;;  %s1060_s9 = smov %s763_s10 }
 0x18c   : > { %s1061_s10 = smov %s767_s11  ;;  %s1062_s11 = smov %s894_s8 }
 0x18d   : > { %s1063_s12 = smov %s860_s21  ;;  %18 = sbr.rel (!%p16_p7) target bundleno = 6 (0x6), region = 77 }
 0x194   :  { %473 = vsyncpa [#allocation3], 1 }
 0x195   :  { %475 = vsyncpa [#allocation3 + $0x1], 1 }
 0x196   :  { %476 = vsyncpa [#allocation6], 1 }
 0x197   :  { %477 = vsyncpa [#allocation4], 1 }
 0x198   :  { %479 = vsyncpa [#allocation4 + $0x1], 1 }

</bundles_post_ra>
